<compile_context>
chip_gen: v5e
topology: v5e:2x2
jax: 0.10.0
libtpu: 0.0.40
codegen_flags: <defaults>
</compile_context>

<pallas_src>
import jax
import jax.numpy as jnp
from jax.experimental import pallas as pl
from jax.experimental.pallas import tpu as pltpu

HIDDEN = 768   # n_head * emb
MID = 64       # linear1 out features


def _verifier_fused_kernel(x_ref, wf_ref, bf_ref, o_ref):
    """Processes one (batch, senlen-tile) block, all heads at once.

    x_ref : (1, n_head, TILE_S, emb)  hidden-state block, original (untransposed) layout
    wf_ref: (n_head, 1, emb)          fused weight, resident (constant index_map)
    bf_ref: (1, 1)   [SMEM]           fused bias scalar
    o_ref : (1, TILE_S, 1)            output block for this tile
    """
    n_head = x_ref.shape[1]

    # Accumulate per-head products in the (TILE_S, emb) plane (pure VPU adds,
    # f32 accumulation), then do a single XLU lane-reduce over emb at the end.
    # Deliberately no MXU: an N=1 projection would waste it; the kernel is
    # HBM-read bound and compute has large slack.
    acc = x_ref[0, 0].astype(jnp.float32) * wf_ref[0]          # (TILE_S, emb)
    for h in range(1, n_head):                                 # unrolled, n_head is static
        acc = acc + x_ref[0, h].astype(jnp.float32) * wf_ref[h]

    dot = jnp.sum(acc, axis=-1, keepdims=True)                 # (TILE_S, 1)
    o_ref[0] = jax.nn.sigmoid(dot + bf_ref[0, 0])


def _choose_tile_s(senlen):
    """Largest power-of-two divisor of senlen up to 512 (keeps blocks ~1-4 MiB
    and respects the (8,128) tiling rule); falls back to the full senlen."""
    for t in (512, 256, 128, 64, 32, 16, 8):
        if senlen % t == 0:
            return t
    return senlen


def verifier_forward(x, w1, b1, w2, b2, *, tile_s=None, x_compute_dtype=jnp.bfloat16):
    """Pallas forward of the Verifier head.

    x : (batch, n_head, senlen, emb) with n_head * emb == 768
    w1: (768, 64), b1: (1, 64)   (linear1, `x @ w1 + b1` convention)
    w2: (64, 1),  b2: (1, 1)     (linear2)
    x_compute_dtype: dtype x is streamed from HBM in (bf16 halves the read
        traffic of this read-bound kernel; pass None / jnp.float32 for the
        exact-f32 path).  Accumulation is always f32 inside the kernel.

    Returns sigmoid(linear2(linear1(x.transpose(1,2).reshape(b, senlen, 768))))
    with shape (batch, senlen, 1), matching the PyTorch module.
    """
    batch, n_head, senlen, emb = x.shape
    assert n_head * emb == HIDDEN, (n_head, emb)

    if x_compute_dtype is not None and x.dtype != x_compute_dtype:
        x = x.astype(x_compute_dtype)

    if tile_s is None:
        tile_s = _choose_tile_s(senlen)
    assert senlen % tile_s == 0, (senlen, tile_s)

    # Algebraic fusion — valid because there is no activation between the two
    # linear layers.  Feature f = h*emb + e of the transposed view maps to
    # [h, e] of the original layout, so reshape the fused 768-vector into
    # per-head emb-wide slices.  Weights stay f32 (only 3 KiB).
    w_fused = (w1 @ w2).reshape(n_head, 1, emb).astype(jnp.float32)   # (n_head, 1, emb)
    b_fused = (b1 @ w2 + b2).reshape(1, 1).astype(jnp.float32)        # scalar, SMEM

    return pl.pallas_call(
        _verifier_fused_kernel,
        out_shape=jax.ShapeDtypeStruct((batch, senlen, 1), jnp.float32),
        grid_spec=pltpu.PrefetchScalarGridSpec(
            num_scalar_prefetch=0,
            grid=(batch, senlen // tile_s),
            in_specs=[
                # All heads per step; double-buffered by the BlockSpec pipeline.
                pl.BlockSpec((1, n_head, tile_s, emb), lambda b, s: (b, 0, s, 0)),
                # Resident fused weight (constant index map -> fetched once).
                pl.BlockSpec((n_head, 1, emb), lambda b, s: (0, 0, 0)),
                # Fused bias scalar in SMEM.
                pl.BlockSpec(memory_space=pltpu.MemorySpace.SMEM),
            ],
            out_specs=pl.BlockSpec((1, tile_s, 1), lambda b, s: (b, s, 0)),
        ),
        compiler_params=pltpu.CompilerParams(
            # No cross-step dependence -> both axes parallel (v7x 2-TC sharding).
            dimension_semantics=("parallel", "parallel"),
        ),
    )(x, w_fused, b_fused)


def _reference(x, w1, b1, w2, b2):
    """Un-fused f32 reference matching the PyTorch module exactly."""
    batch, n_head, senlen, emb = x.shape
    x2 = jnp.transpose(x, (0, 2, 1, 3)).reshape(batch, senlen, HIDDEN)
    h = x2 @ w1 + b1.reshape(1, 1, MID)
    y = h @ w2 + b2.reshape(1, 1, 1)
    return jax.nn.sigmoid(y)


if __name__ == "__main__":
    key = jax.random.PRNGKey(0)
    k_x, k_w1, k_b1, k_w2, k_b2 = jax.random.split(key, 5)

    # Small shapes consistent with the module: (batch, n_head, senlen, emb),
    # n_head*emb = 768.
    batch, n_head, senlen, emb = 2, 12, 8, 64
    x = jax.random.normal(k_x, (batch, n_head, senlen, emb), dtype=jnp.float32)

    # Deterministic parameter init (nn.Linear-like uniform fan-in scaling).
    bound1 = 1.0 / HIDDEN ** 0.5
    bound2 = 1.0 / MID ** 0.5
    w1 = jax.random.uniform(k_w1, (HIDDEN, MID), jnp.float32, -bound1, bound1)
    b1 = jax.random.uniform(k_b1, (1, MID), jnp.float32, -bound1, bound1)
    w2 = jax.random.uniform(k_w2, (MID, 1), jnp.float32, -bound2, bound2)
    b2 = jax.random.uniform(k_b2, (1, 1), jnp.float32, -bound2, bound2)

    ref = _reference(x, w1, b1, w2, b2)

    # Exact f32 streaming path (tolerance only covers the exact reassociation
    # from the linear1/linear2 fusion).
    out_f32 = jax.block_until_ready(
        verifier_forward(x, w1, b1, w2, b2, x_compute_dtype=None))
    assert out_f32.shape == (batch, senlen, 1), out_f32.shape
    assert jnp.allclose(out_f32, ref, atol=2e-5, rtol=1e-5), "f32 mismatch vs reference"

    # Default bf16-input path (halved HBM traffic), f32 accumulation in-kernel.
    out_bf16 = jax.block_until_ready(verifier_forward(x, w1, b1, w2, b2))
    assert jnp.allclose(out_bf16, ref, atol=5e-3, rtol=0.0), "bf16 mismatch vs reference"

    # Exercise the multi-tile senlen grid (senlen > TILE_S) as well.
    senlen2 = 1024
    x2 = jax.random.normal(k_x, (batch, n_head, senlen2, emb), dtype=jnp.float32)
    ref2 = _reference(x2, w1, b1, w2, b2)
    out2 = jax.block_until_ready(verifier_forward(x2, w1, b1, w2, b2))
    assert out2.shape == (batch, senlen2, 1), out2.shape
    assert jnp.allclose(out2, ref2, atol=5e-3, rtol=0.0), "tiled bf16 mismatch vs reference"

    print("KERNEL_OK")
</pallas_src>

<mosaic_0001>
module attributes {stable_mosaic.version = 11 : i64} {
  func.func @_verifier_fused_kernel(%arg0: i32, %arg1: i32, %arg2: memref<1x12x8x64xf32, #tpu.memory_space<vmem>>, %arg3: memref<12x1x64xf32, #tpu.memory_space<vmem>>, %arg4: memref<1x1xf32, #tpu.memory_space<smem>>, %arg5: memref<1x8x1xf32, #tpu.memory_space<vmem>>) attributes {dimension_semantics = [#tpu.dimension_semantics<parallel>, #tpu.dimension_semantics<parallel>], iteration_bounds = array<i64: 2, 1>, scalar_prefetch = 0 : i64, scratch_operands = 0 : i64, tpu.core_type = #tpu.core_type<tc>, window_params = [{transform_indices = @transform_0, window_bounds = array<i64: 1, 12, 8, 64>}, {pipeline_mode = #tpu.pipeline_mode<synchronous>, transform_indices = @transform_1, window_bounds = array<i64: 12, 1, 64>}, {transform_indices = @transform_2, window_bounds = array<i64: 1, 1>}, {transform_indices = @transform_3, window_bounds = array<i64: 1, 8, 1>}]} {
    %c0 = arith.constant 0 : index
    %c0_0 = arith.constant 0 : index
    %c0_1 = arith.constant 0 : index
    %c0_2 = arith.constant 0 : index
    %0 = vector.load %arg2[%c0, %c0_0, %c0_1, %c0_2] : memref<1x12x8x64xf32, #tpu.memory_space<vmem>>, vector<1x1x8x64xf32>
    %1 = vector.shape_cast %0 : vector<1x1x8x64xf32> to vector<8x64xf32>
    %c0_3 = arith.constant 0 : index
    %c0_4 = arith.constant 0 : index
    %c0_5 = arith.constant 0 : index
    %2 = vector.load %arg3[%c0_3, %c0_4, %c0_5] : memref<12x1x64xf32, #tpu.memory_space<vmem>>, vector<1x1x64xf32>
    %3 = vector.shape_cast %2 : vector<1x1x64xf32> to vector<1x64xf32>
    %4 = vector.broadcast %3 : vector<1x64xf32> to vector<8x64xf32>
    %5 = arith.mulf %1, %4 : vector<8x64xf32>
    %c0_6 = arith.constant 0 : index
    %c1 = arith.constant 1 : index
    %c0_7 = arith.constant 0 : index
    %c0_8 = arith.constant 0 : index
    %6 = vector.load %arg2[%c0_6, %c1, %c0_7, %c0_8] : memref<1x12x8x64xf32, #tpu.memory_space<vmem>>, vector<1x1x8x64xf32>
    %7 = vector.shape_cast %6 : vector<1x1x8x64xf32> to vector<8x64xf32>
    %c1_9 = arith.constant 1 : index
    %c0_10 = arith.constant 0 : index
    %c0_11 = arith.constant 0 : index
    %8 = vector.load %arg3[%c1_9, %c0_10, %c0_11] : memref<12x1x64xf32, #tpu.memory_space<vmem>>, vector<1x1x64xf32>
    %9 = vector.shape_cast %8 : vector<1x1x64xf32> to vector<1x64xf32>
    %10 = vector.broadcast %9 : vector<1x64xf32> to vector<8x64xf32>
    %11 = arith.mulf %7, %10 : vector<8x64xf32>
    %12 = arith.addf %5, %11 : vector<8x64xf32>
    %c0_12 = arith.constant 0 : index
    %c2 = arith.constant 2 : index
    %c0_13 = arith.constant 0 : index
    %c0_14 = arith.constant 0 : index
    %13 = vector.load %arg2[%c0_12, %c2, %c0_13, %c0_14] : memref<1x12x8x64xf32, #tpu.memory_space<vmem>>, vector<1x1x8x64xf32>
    %14 = vector.shape_cast %13 : vector<1x1x8x64xf32> to vector<8x64xf32>
    %c2_15 = arith.constant 2 : index
    %c0_16 = arith.constant 0 : index
    %c0_17 = arith.constant 0 : index
    %15 = vector.load %arg3[%c2_15, %c0_16, %c0_17] : memref<12x1x64xf32, #tpu.memory_space<vmem>>, vector<1x1x64xf32>
    %16 = vector.shape_cast %15 : vector<1x1x64xf32> to vector<1x64xf32>
    %17 = vector.broadcast %16 : vector<1x64xf32> to vector<8x64xf32>
    %18 = arith.mulf %14, %17 : vector<8x64xf32>
    %19 = arith.addf %12, %18 : vector<8x64xf32>
    %c0_18 = arith.constant 0 : index
    %c3 = arith.constant 3 : index
    %c0_19 = arith.constant 0 : index
    %c0_20 = arith.constant 0 : index
    %20 = vector.load %arg2[%c0_18, %c3, %c0_19, %c0_20] : memref<1x12x8x64xf32, #tpu.memory_space<vmem>>, vector<1x1x8x64xf32>
    %21 = vector.shape_cast %20 : vector<1x1x8x64xf32> to vector<8x64xf32>
    %c3_21 = arith.constant 3 : index
    %c0_22 = arith.constant 0 : index
    %c0_23 = arith.constant 0 : index
    %22 = vector.load %arg3[%c3_21, %c0_22, %c0_23] : memref<12x1x64xf32, #tpu.memory_space<vmem>>, vector<1x1x64xf32>
    %23 = vector.shape_cast %22 : vector<1x1x64xf32> to vector<1x64xf32>
    %24 = vector.broadcast %23 : vector<1x64xf32> to vector<8x64xf32>
    %25 = arith.mulf %21, %24 : vector<8x64xf32>
    %26 = arith.addf %19, %25 : vector<8x64xf32>
    %c0_24 = arith.constant 0 : index
    %c4 = arith.constant 4 : index
    %c0_25 = arith.constant 0 : index
    %c0_26 = arith.constant 0 : index
    %27 = vector.load %arg2[%c0_24, %c4, %c0_25, %c0_26] : memref<1x12x8x64xf32, #tpu.memory_space<vmem>>, vector<1x1x8x64xf32>
    %28 = vector.shape_cast %27 : vector<1x1x8x64xf32> to vector<8x64xf32>
    %c4_27 = arith.constant 4 : index
    %c0_28 = arith.constant 0 : index
    %c0_29 = arith.constant 0 : index
    %29 = vector.load %arg3[%c4_27, %c0_28, %c0_29] : memref<12x1x64xf32, #tpu.memory_space<vmem>>, vector<1x1x64xf32>
    %30 = vector.shape_cast %29 : vector<1x1x64xf32> to vector<1x64xf32>
    %31 = vector.broadcast %30 : vector<1x64xf32> to vector<8x64xf32>
    %32 = arith.mulf %28, %31 : vector<8x64xf32>
    %33 = arith.addf %26, %32 : vector<8x64xf32>
    %c0_30 = arith.constant 0 : index
    %c5 = arith.constant 5 : index
    %c0_31 = arith.constant 0 : index
    %c0_32 = arith.constant 0 : index
    %34 = vector.load %arg2[%c0_30, %c5, %c0_31, %c0_32] : memref<1x12x8x64xf32, #tpu.memory_space<vmem>>, vector<1x1x8x64xf32>
    %35 = vector.shape_cast %34 : vector<1x1x8x64xf32> to vector<8x64xf32>
    %c5_33 = arith.constant 5 : index
    %c0_34 = arith.constant 0 : index
    %c0_35 = arith.constant 0 : index
    %36 = vector.load %arg3[%c5_33, %c0_34, %c0_35] : memref<12x1x64xf32, #tpu.memory_space<vmem>>, vector<1x1x64xf32>
    %37 = vector.shape_cast %36 : vector<1x1x64xf32> to vector<1x64xf32>
    %38 = vector.broadcast %37 : vector<1x64xf32> to vector<8x64xf32>
    %39 = arith.mulf %35, %38 : vector<8x64xf32>
    %40 = arith.addf %33, %39 : vector<8x64xf32>
    %c0_36 = arith.constant 0 : index
    %c6 = arith.constant 6 : index
    %c0_37 = arith.constant 0 : index
    %c0_38 = arith.constant 0 : index
    %41 = vector.load %arg2[%c0_36, %c6, %c0_37, %c0_38] : memref<1x12x8x64xf32, #tpu.memory_space<vmem>>, vector<1x1x8x64xf32>
    %42 = vector.shape_cast %41 : vector<1x1x8x64xf32> to vector<8x64xf32>
    %c6_39 = arith.constant 6 : index
    %c0_40 = arith.constant 0 : index
    %c0_41 = arith.constant 0 : index
    %43 = vector.load %arg3[%c6_39, %c0_40, %c0_41] : memref<12x1x64xf32, #tpu.memory_space<vmem>>, vector<1x1x64xf32>
    %44 = vector.shape_cast %43 : vector<1x1x64xf32> to vector<1x64xf32>
    %45 = vector.broadcast %44 : vector<1x64xf32> to vector<8x64xf32>
    %46 = arith.mulf %42, %45 : vector<8x64xf32>
    %47 = arith.addf %40, %46 : vector<8x64xf32>
    %c0_42 = arith.constant 0 : index
    %c7 = arith.constant 7 : index
    %c0_43 = arith.constant 0 : index
    %c0_44 = arith.constant 0 : index
    %48 = vector.load %arg2[%c0_42, %c7, %c0_43, %c0_44] : memref<1x12x8x64xf32, #tpu.memory_space<vmem>>, vector<1x1x8x64xf32>
    %49 = vector.shape_cast %48 : vector<1x1x8x64xf32> to vector<8x64xf32>
    %c7_45 = arith.constant 7 : index
    %c0_46 = arith.constant 0 : index
    %c0_47 = arith.constant 0 : index
    %50 = vector.load %arg3[%c7_45, %c0_46, %c0_47] : memref<12x1x64xf32, #tpu.memory_space<vmem>>, vector<1x1x64xf32>
    %51 = vector.shape_cast %50 : vector<1x1x64xf32> to vector<1x64xf32>
    %52 = vector.broadcast %51 : vector<1x64xf32> to vector<8x64xf32>
    %53 = arith.mulf %49, %52 : vector<8x64xf32>
    %54 = arith.addf %47, %53 : vector<8x64xf32>
    %c0_48 = arith.constant 0 : index
    %c8 = arith.constant 8 : index
    %c0_49 = arith.constant 0 : index
    %c0_50 = arith.constant 0 : index
    %55 = vector.load %arg2[%c0_48, %c8, %c0_49, %c0_50] : memref<1x12x8x64xf32, #tpu.memory_space<vmem>>, vector<1x1x8x64xf32>
    %56 = vector.shape_cast %55 : vector<1x1x8x64xf32> to vector<8x64xf32>
    %c8_51 = arith.constant 8 : index
    %c0_52 = arith.constant 0 : index
    %c0_53 = arith.constant 0 : index
    %57 = vector.load %arg3[%c8_51, %c0_52, %c0_53] : memref<12x1x64xf32, #tpu.memory_space<vmem>>, vector<1x1x64xf32>
    %58 = vector.shape_cast %57 : vector<1x1x64xf32> to vector<1x64xf32>
    %59 = vector.broadcast %58 : vector<1x64xf32> to vector<8x64xf32>
    %60 = arith.mulf %56, %59 : vector<8x64xf32>
    %61 = arith.addf %54, %60 : vector<8x64xf32>
    %c0_54 = arith.constant 0 : index
    %c9 = arith.constant 9 : index
    %c0_55 = arith.constant 0 : index
    %c0_56 = arith.constant 0 : index
    %62 = vector.load %arg2[%c0_54, %c9, %c0_55, %c0_56] : memref<1x12x8x64xf32, #tpu.memory_space<vmem>>, vector<1x1x8x64xf32>
    %63 = vector.shape_cast %62 : vector<1x1x8x64xf32> to vector<8x64xf32>
    %c9_57 = arith.constant 9 : index
    %c0_58 = arith.constant 0 : index
    %c0_59 = arith.constant 0 : index
    %64 = vector.load %arg3[%c9_57, %c0_58, %c0_59] : memref<12x1x64xf32, #tpu.memory_space<vmem>>, vector<1x1x64xf32>
    %65 = vector.shape_cast %64 : vector<1x1x64xf32> to vector<1x64xf32>
    %66 = vector.broadcast %65 : vector<1x64xf32> to vector<8x64xf32>
    %67 = arith.mulf %63, %66 : vector<8x64xf32>
    %68 = arith.addf %61, %67 : vector<8x64xf32>
    %c0_60 = arith.constant 0 : index
    %c10 = arith.constant 10 : index
    %c0_61 = arith.constant 0 : index
    %c0_62 = arith.constant 0 : index
    %69 = vector.load %arg2[%c0_60, %c10, %c0_61, %c0_62] : memref<1x12x8x64xf32, #tpu.memory_space<vmem>>, vector<1x1x8x64xf32>
    %70 = vector.shape_cast %69 : vector<1x1x8x64xf32> to vector<8x64xf32>
    %c10_63 = arith.constant 10 : index
    %c0_64 = arith.constant 0 : index
    %c0_65 = arith.constant 0 : index
    %71 = vector.load %arg3[%c10_63, %c0_64, %c0_65] : memref<12x1x64xf32, #tpu.memory_space<vmem>>, vector<1x1x64xf32>
    %72 = vector.shape_cast %71 : vector<1x1x64xf32> to vector<1x64xf32>
    %73 = vector.broadcast %72 : vector<1x64xf32> to vector<8x64xf32>
    %74 = arith.mulf %70, %73 : vector<8x64xf32>
    %75 = arith.addf %68, %74 : vector<8x64xf32>
    %c0_66 = arith.constant 0 : index
    %c11 = arith.constant 11 : index
    %c0_67 = arith.constant 0 : index
    %c0_68 = arith.constant 0 : index
    %76 = vector.load %arg2[%c0_66, %c11, %c0_67, %c0_68] : memref<1x12x8x64xf32, #tpu.memory_space<vmem>>, vector<1x1x8x64xf32>
    %77 = vector.shape_cast %76 : vector<1x1x8x64xf32> to vector<8x64xf32>
    %c11_69 = arith.constant 11 : index
    %c0_70 = arith.constant 0 : index
    %c0_71 = arith.constant 0 : index
    %78 = vector.load %arg3[%c11_69, %c0_70, %c0_71] : memref<12x1x64xf32, #tpu.memory_space<vmem>>, vector<1x1x64xf32>
    %79 = vector.shape_cast %78 : vector<1x1x64xf32> to vector<1x64xf32>
    %80 = vector.broadcast %79 : vector<1x64xf32> to vector<8x64xf32>
    %81 = arith.mulf %77, %80 : vector<8x64xf32>
    %82 = arith.addf %75, %81 : vector<8x64xf32>
    %cst = arith.constant dense<0.000000e+00> : vector<8xf32>
    %83 = vector.multi_reduction <add>, %82, %cst [1] : vector<8x64xf32> to vector<8xf32>
    %84 = vector.shape_cast %83 : vector<8xf32> to vector<8x1xf32>
    %c0_72 = arith.constant 0 : index
    %c0_73 = arith.constant 0 : index
    %85 = memref.load %arg4[%c0_72, %c0_73] : memref<1x1xf32, #tpu.memory_space<smem>>
    %86 = vector.broadcast %85 : f32 to vector<8x1xf32>
    %87 = arith.addf %84, %86 : vector<8x1xf32>
    %88 = arith.negf %87 : vector<8x1xf32>
    %89 = math.exp %88 : vector<8x1xf32>
    %cst_74 = arith.constant 1.000000e+00 : f32
    %90 = vector.broadcast %cst_74 : f32 to vector<8x1xf32>
    %91 = arith.addf %90, %89 : vector<8x1xf32>
    %92 = arith.divf %90, %91 : vector<8x1xf32>
    %c0_75 = arith.constant 0 : index
    %c0_76 = arith.constant 0 : index
    %c0_77 = arith.constant 0 : index
    %93 = vector.load %arg5[%c0_75, %c0_76, %c0_77] : memref<1x8x1xf32, #tpu.memory_space<vmem>>, vector<1x8x1xf32>
    %94 = vector.shape_cast %93 : vector<1x8x1xf32> to vector<8x1xf32>
    %95 = vector.shape_cast %92 : vector<8x1xf32> to vector<1x8x1xf32>
    tpu.vector_store %arg5[%c0_75, %c0_76, %c0_77], %95 {strides = array<i32>} : memref<1x8x1xf32, #tpu.memory_space<vmem>>, vector<1x8x1xf32>,
    return
  }
  func.func @transform_0(%arg0: i32, %arg1: i32) -> (i32, i32, i32, i32) {
    %c0_i32 = arith.constant 0 : i32
    %c0_i32_0 = arith.constant 0 : i32
    %c0_i32_1 = arith.constant 0 : i32
    return %arg0, %c0_i32, %arg1, %c0_i32_0 : i32, i32, i32, i32
  }
  func.func @transform_1(%arg0: i32, %arg1: i32) -> (i32, i32, i32) {
    %c0_i32 = arith.constant 0 : i32
    %c0_i32_0 = arith.constant 0 : i32
    %c0_i32_1 = arith.constant 0 : i32
    %c0_i32_2 = arith.constant 0 : i32
    return %c0_i32, %c0_i32_0, %c0_i32_1 : i32, i32, i32
  }
  func.func @transform_2(%arg0: i32, %arg1: i32) -> (i32, i32) {
    %c0_i32 = arith.constant 0 : i32
    %c0_i32_0 = arith.constant 0 : i32
    %c0_i32_1 = arith.constant 0 : i32
    return %c0_i32, %c0_i32_0 : i32, i32
  }
  func.func @transform_3(%arg0: i32, %arg1: i32) -> (i32, i32, i32) {
    %c0_i32 = arith.constant 0 : i32
    %c0_i32_0 = arith.constant 0 : i32
    return %arg0, %arg1, %c0_i32 : i32, i32, i32
  }
}

</mosaic_0001>

<bundles_post_ra>
// kernel: tpu_custom_call.1
= control target key start
LH: loop header
LB: loop body
LE: loop exit
PB: predicated region body
PF: predicated region fallthrough
CT: control target
= control target key end

     0   :  { %s835_s0 = inlined_call_operand.hbm [shape: f32[2,12,8,64], index: 0, kind: input, shape index: {}]   ;;  %s836_s1 = inlined_call_operand.hbm [shape: f32[12,1,64], index: 1, kind: input, shape index: {}]   ;;  %s837_s2 = inlined_call_operand.<no memory space> [shape: f32[1,1], index: 2, kind: input, shape index: {}]   ;;  %s838_s3 = inlined_call_operand.vmem [shape: f32[2,8,1], index: 3, kind: output, shape index: {}]  }
   0x1   :  { %8 = sst [smem:[#allocation2]] %s837_s2 }
   0x2   :  { %9 = vsyncpa [#allocation4], 0 }
   0x3   :  { %11 = vsyncpa [#allocation4 + $0x1], 0 }
   0x4   :  { %12 = vsyncpa [#allocation6], 0  ;;  %s716_s14 = smov 0   ;;  %s718_s15 = smov 0  }
   0x5   :  { %s720_s16 = smov 0   ;;  %s722_s17 = smov 0  }
   0x6   :  { %s724_s18 = smov 0   ;;  %s726_s19 = smov 0  }
   0x7 LB: > { %s460_s2 = sadd.s32 4294967295, %s686_s19   ;;  %p52_p0 = scmp.ne.s32.totalorder %s670_s15, %s666_s14  ;;  %s686_s19 = sphi %s726_s19, %s18_s19   ;;  %s682_s18 = sphi %s724_s18, %s846_s18   ;;  %s678_s17 = sphi %s722_s17, %s845_s17   ;;  %s674_s16 = sphi %s720_s16, %s844_s16   ;;  %s670_s15 = sphi %s718_s15, %s843_s15   ;;  %s666_s14 = sphi %s716_s14, %s842_s14  }
   0x8   : > { %p746_p1 = scmp.eq.s32.totalorder %s460_s2, 0  ;;  %p462_p2 = scmp.ge.s32.totalorder %s686_s19, 1 }
   0x9   : > { %p133_p3 = scmp.lt.s32.totalorder %s686_s19, 3  ;;  %s144_s24 = sshll.u32 %s836_s1, 4  ;;  %s145_s24 = int_to_ptr.hbm [resolvable:$true] %s144_s24 }
   0xa   : > { %p754_p4 = por %p746_p1, %p52_p0  ;;  %s688_s26 = smov [#allocation5]  }
   0xb   : > { %p761_p5 = pnand %p462_p2, %p133_p3  ;;  %s146_s27 = sshll.u32 %s688_s26, 4  ;;  %s147_s27 = int_to_ptr.vmem [resolvable:$true] %s146_s27 }
   0xc   : > { %s689_s28 = smov 16   ;;  %s690_s29 = smov 1  }
   0xd   : > { %p492_p6 = pneg %p761_p5  ;;  %s30_s30 = sadd.s32 1, %s682_s18 }
   0xe   : > { %p32_p8 = scmp.ge.s32.totalorder %s30_s30, 2  ;;  %s39_s4 = sadd.s32 1, %s674_s16 }
   0xf   : > { %p493_p7 = pnand %p492_p6, %p746_p1  ;;  %p46_p9 = scmp.ne.s32.totalorder %s674_s16, %s670_s15 }
  0x10   : > { %p47_p10 = scmp.eq.s32.totalorder %s686_s19, 0  ;;  %s848_s30 = smov (%p32_p8, %s30_s30), 0 }
  0x11   : > { %495 = dma.hbm_to_vmem [thread:$0]  (!%p493_p7), %s145_s24, 192, %s147_s27, [#allocation6], %s689_s28, %s689_s28, %s690_s29  }
  0x12   : > { %p48_p11 = por %p47_p10, %p46_p9  ;;  %p501_p12 = scmp.lt.s32.totalorder %s686_s19, 2 }
  0x13   : > { %s34_s5 = ssub.s32 %s682_s18, %s848_s30  ;;  %s163_s6 = sand.u32 1, %s674_s16  }
  0x14   : > { %p37_p13 = scmp.eq.s32.totalorder %s34_s5, 0  ;;  %s483_s7 = smul.u32 96, %s163_s6 }
  0x15   : > { %p497_p0 = pnand %p501_p12, %p48_p11  ;;  %s484_s9 = smul.u32 96, %s682_s18 }
  0x16   : > { %s781_s8 = scalar_select %p37_p13, %s674_s16, %s39_s4  }
  0x17   : > { %s167_s10 = scalar_lea.vmem [#allocation3], %s483_s7  ;;  %s173_s14 = scalar_lea.hbm %s835_s0, %s484_s9 }
  0x18   : > { %s176_s11 = sshll.u32 %s167_s10, 4  ;;  %s174_s2 = sshll.u32 %s173_s14, 4  ;;  %s177_s11 = int_to_ptr.vmem [resolvable:$true] %s176_s11  ;;  %s175_s2 = int_to_ptr.hbm [resolvable:$true] %s174_s2 }
  0x19   : > { %s164_s22 = scalar_lea.sflag [#allocation4], %s163_s6  ;;  %s691_s23 = smov 128  }
  0x1a   : > { %s692_s24 = smov 8   ;;  %188 = sbr.rel (%p761_p5) target bundleno = 209 (0xd1), region = 32 }
  0x1b   : > { %499 = dma.hbm_to_vmem [thread:$0]  (!%p497_p0), %s175_s2, 1536, %s177_s11, %s164_s22, %s691_s23, %s691_s23, %s692_s24  }
  0x1c   : > { %s190_s26 = sand.u32 (!%p761_p5), 1, %s670_s15  }
  0x1d   : > { %s485_s27 = smul.u32 (!%p761_p5), 96, %s190_s26  ;;  %s191_s28 = scalar_lea.sflag (!%p761_p5), [#allocation4], %s190_s26 }
  0x1f   : > { %s790_s29 = scalar_lea.vmem [#allocation3], %s485_s27 }
  0x20   : > { %657 = dma.done.wait (%p754_p4), %s191_s28, 1536  }
  0x21   : > { %659 = vsyncadd (%p754_p4), %s191_s28, 4294965760 }
  0x22   : > { %661 = dma.done.wait (%p746_p1), [#allocation6], 192  }
  0x23   : > { %663 = vsyncadd (%p746_p1), [#allocation6], 4294967104  ;;  %v232_v0 = vld [vmem:[%s790_s29] sm:$0xff]  ;;  %v469_v2 = vld [vmem:[%s790_s29 + $0x8] sm:$0xff]  ;;  %vm337_vm0 = vcmask 523264   ;;  %s341_s20 = sld [smem:[#allocation2]] }
  0x24   : > { %v556_v1 = vld [vmem:[#allocation5] ss:$0 sm:$0xff]  ;;  %v557_v3 = vld [vmem:[#allocation5 + $0x1] ss:$0 sm:$0xff]  ;;  %v470_v5 = vld [vmem:[%s790_s29 + $0x10] sm:$0xff]  ;;  %p225_p1 = scmp.lt.s32.totalorder %s678_s17, 1 }
  0x25   : > { %v237_v4 = vmul.f32 %v556_v1, %v232_v0  ;;  %v558_v6 = vld [vmem:[#allocation5 + $0x2] ss:$0 sm:$0xff]  ;;  %v245_v7 = vmul.f32 %v557_v3, %v469_v2  ;;  %v471_v8 = vld [vmem:[%s790_s29 + $0x18] sm:$0xff]  ;;  %v559_v9 = vld [vmem:[#allocation5 + $0x3] ss:$0 sm:$0xff]  ;;  %vm363_vm4 = vcmask 7168  }
  0x26   : > { %v254_v10 = vmul.f32 %v558_v6, %v470_v5  ;;  %v472_v11 = vld [vmem:[%s790_s29 + $0x20] sm:$0xff]  ;;  %v263_v14 = vmul.f32 %v559_v9, %v471_v8  ;;  %v473_v16 = vld [vmem:[%s790_s29 + $0x28] sm:$0xff]  ;;  %v474_v20 = vld [vmem:[%s790_s29 + $0x30] sm:$0xff]  ;;  %s850_s17 = smov (!%p225_p1, %s678_s17), 1 }
  0x27   : > { %v560_v12 = vld [vmem:[#allocation5 + $0x4] ss:$0 sm:$0xff]  ;;  %v246_v13 = vadd.f32 %v245_v7, %v237_v4  ;;  %v561_v15 = vld [vmem:[#allocation5 + $0x5] ss:$0 sm:$0xff]  ;;  %v562_v19 = vld [vmem:[#allocation5 + $0x6] ss:$0 sm:$0xff] }
  0x28   : > { %v272_v18 = vmul.f32 %v560_v12, %v472_v11  ;;  %v281_v22 = vmul.f32 %v561_v15, %v473_v16  ;;  %v563_v23 = vld [vmem:[#allocation5 + $0x7] ss:$0 sm:$0xff]  ;;  %v475_v24 = vld [vmem:[%s790_s29 + $0x38] sm:$0xff]  ;;  %v290_v26 = vmul.f32 %v562_v19, %v474_v20  ;;  %v564_v27 = vld [vmem:[#allocation5 + $0x8] ss:$0 sm:$0xff]  ;;  %s468_s21 = sshll.u32 %s850_s17, 3 }
  0x29   : > { %v255_v17 = vadd.f32 %v254_v10, %v246_v13  ;;  %v476_v28 = vld [vmem:[%s790_s29 + $0x40] sm:$0xff]  ;;  %v299_v30 = vmul.f32 %v563_v23, %v475_v24  ;;  %v565_v31 = vld [vmem:[#allocation5 + $0x9] ss:$0 sm:$0xff]  ;;  %v566_v35 = vld [vmem:[#allocation5 + $0xa] ss:$0 sm:$0xff]  ;;  %v342_v48 = vstv %s341_s20  ;;  %s231_s5 = scalar_lea.vmem %s838_s3, %s468_s21 }
  0x2a   : > { %v477_v32 = vld [vmem:[%s790_s29 + $0x48] sm:$0xff]  ;;  %v308_v34 = vmul.f32 %v564_v27, %v476_v28  ;;  %v478_v36 = vld [vmem:[%s790_s29 + $0x50] sm:$0xff]  ;;  %v479_v40 = vld [vmem:[%s790_s29 + $0x58] sm:$0xff] }
  0x2b   : > { %v264_v21 = vadd.f32 %v263_v14, %v255_v17  ;;  %v317_v38 = vmul.f32 %v565_v31, %v477_v32  ;;  %v567_v39 = vld [vmem:[#allocation5 + $0xb] ss:$0 sm:$0xff]  ;;  %v326_v42 = vmul.f32 %v566_v35, %v478_v36 }
  0x2c   : > { %v335_v44 = vmul.f32 %v567_v39, %v479_v40 }
  0x2d   : > { %v273_v25 = vadd.f32 %v272_v18, %v264_v21 }
  0x2f   : > { %v282_v29 = vadd.f32 %v281_v22, %v273_v25 }
  0x31   : > { %v291_v33 = vadd.f32 %v290_v26, %v282_v29 }
  0x33   : > { %v300_v37 = vadd.f32 %v299_v30, %v291_v33 }
  0x35   : > { %v309_v41 = vadd.f32 %v308_v34, %v300_v37 }
  0x37   : > { %v318_v43 = vadd.f32 %v317_v38, %v309_v41 }
  0x39   : > { %v327_v45 = vadd.f32 %v326_v42, %v318_v43 }
  0x3b   : > { %v336_v46 = vadd.f32 %v335_v44, %v327_v45 }
  0x3d   : > { %v338_v47 = vsel %vm337_vm0, %v336_v46, 0.0 }
  0x3e   : > { %339 = vadd.xlane.f32.xlu0 %v338_v47 }
  0xb1   : > { %v340_v49 = vpop.xlane.xlu0 %339 }
  0xb2   : > { %v343_v50 = vadd.f32 %v342_v48, %v340_v49 }
  0xb4   : > { %v480_v51 = vmul.f32 -1.442695, %v343_v50 }
  0xb6   : > { %568 = vpow2.f32 %v480_v51 }
  0xbc   : > { %v569_v52 = vpop.eup %568 }
  0xbd   : > { %v347_v53 = vadd.f32 1.0, %v569_v52 }
  0xbf   : > { %570 = vrcp.f32 %v347_v53  ;;  %v359_v57 = vand.u32 2147483648, %v347_v53  ;;  %v357_v59 = vand.u32 2147483647, %v347_v53  ;;  %vm353_vm2 = vweird.f32 %v347_v53 }
  0xc1   : > { %v360_v61 = vor.u32 1.1754944e-38, %v359_v57  ;;  %vm358_vm5 = vcmp.eq.f32.partialorder %v357_v59, 8.507059e+37 }
  0xc5   : > { %v571_v54 = vpop.eup %570 }
  0xc6   : > { %v349_v55 = vmul.f32 %v571_v54, %v347_v53  ;;  %vm354_vm1 = vweird.f32 %v571_v54 }
  0xc7   : > { %vm355_vm3 = vmor %vm353_vm2, %vm354_vm1 }
  0xc8   : > { %v350_v56 = vsub.f32 1.0, %v349_v55 }
  0xca   : > { %v351_v58 = vmul.f32 %v571_v54, %v350_v56 }
  0xcc   : > { %v352_v60 = vadd.f32 %v571_v54, %v351_v58 }
  0xce   : > { %v356_v62 = vsel %vm355_vm3, %v571_v54, %v352_v60 }
  0xcf   : > { %v361_v63 = vsel %vm358_vm5, %v360_v61, %v356_v62 }
  0xd0   : > { %364 = vst.msk [vmem:[%s231_s5] sm:$0xff] %vm363_vm4, %v361_v63 }
  0xd1 PF: > { %s18_s19 = sadd.s32 1, %s686_s19   ;;  %s842_s14 = smov %s670_s15 }
  0xd2   : > { %p15_p2 = scmp.ge.s32.totalorder %s18_s19, 4   ;;  %s843_s15 = smov %s674_s16 }
  0xd3   : > { %s844_s16 = smov %s781_s8  ;;  %s845_s17 = smov %s682_s18 }
  0xd4   : > { %s846_s18 = smov %s848_s30  ;;  %17 = sbr.rel (!%p15_p2) target bundleno = 7 (0x7), region = 98 }
  0xd9   :  { %390 = vsyncpa [#allocation4], 1 }
  0xda   :  { %392 = vsyncpa [#allocation4 + $0x1], 1 }
  0xdb   :  { %393 = vsyncpa [#allocation6], 1 }

</bundles_post_ra>
